<compile_context>
chip_gen: v7x
topology: tpu7x:2x2x1
jax: 0.10.0
libtpu: 0.0.40
codegen_flags: <defaults>
</compile_context>

<pallas_src>
import functools

import jax
import jax.numpy as jnp
from jax.experimental import pallas as pl
from jax.experimental.pallas import tpu as pltpu

EPS = 1e-5                       # PyTorch BatchNorm1d default eps
DEFAULT_TB = 16384               # batch tile (lane axis); lane-dense f32 working set ~320 B/row
VMEM_LIMIT_BYTES = 32 * 1024 * 1024   # safe on v5e/v6e/v7x; raises v5e's 16 MiB default scope


def mlp_kernel(x_ref, w0_ref, b0_ref, w1_ref, b1_ref, w2_ref, b2_ref, o_ref):
    # Batch sits on the 128-lane axis of every tile (lane-dense layout).
    x = x_ref[...]                                                                  # (7, TB)

    # fc0 (+ folded bn0) -> ReLU        (dropout(p=0.6) is identity in eval mode)
    h = jnp.dot(w0_ref[...], x, preferred_element_type=jnp.float32) + b0_ref[...]   # (32, TB)
    h = jnp.maximum(h, 0.0)

    # fc1 (+ folded bn1) -> ReLU        (dropout(p=0.6) is identity in eval mode)
    h = jnp.dot(w1_ref[...], h, preferred_element_type=jnp.float32) + b1_ref[...]   # (16, TB)
    h = jnp.maximum(h, 0.0)

    # fc2
    out = jnp.dot(w2_ref[...], h, preferred_element_type=jnp.float32) + b2_ref[...]  # (2, TB)
    o_ref[...] = out.astype(o_ref.dtype)


def _fold_bn(w, b, gamma, beta, mean, var):
    """Fold y = (x@w + b - mean) * gamma/sqrt(var+eps) + beta into (w', b')."""
    scale = gamma * jax.lax.rsqrt(var + EPS)          # (1, C)
    return w * scale, (b - mean) * scale + beta       # (K, C), (1, C)


def _round_up(n, m):
    return ((n + m - 1) // m) * m


@functools.partial(jax.jit, static_argnames=("tb",))
def mlp_forward(x, params, tb=DEFAULT_TB):
    B, F = x.shape

    # Host-side BN folding (runs under jit alongside the kernel, negligible cost).
    w0, b0 = _fold_bn(params["w0"], params["b0"], params["g0"], params["be0"],
                      params["m0"], params["v0"])
    w1, b1 = _fold_bn(params["w1"], params["b1"], params["g1"], params["be1"],
                      params["m1"], params["v1"])
    w2, b2 = params["w2"], params["b2"]

    # Transposed ("batch-on-lanes") weights / biases for the lane-dense kernel.
    w0t, b0t = w0.T, b0.T          # (32, 7), (32, 1)
    w1t, b1t = w1.T, b1.T          # (16, 32), (16, 1)
    w2t, b2t = w2.T, b2.T          # (2, 16),  (2, 1)

    # Batch tiling on the lane axis: tile must be a multiple of 128 lanes.
    tile_b = min(tb, _round_up(B, 128))
    tile_b = max(128, _round_up(tile_b, 128))
    Bp = _round_up(B, tile_b)
    grid = (Bp // tile_b,)

    # Single cheap dense copy: transpose x to (7, B) (and pad the ragged tail to Bp).
    # ~28 B/row vs. the 512 B/row a lane-sparse (B,7) pad copy would have moved.
    xt = x.T
    if Bp != B:
        xt = jnp.pad(xt, ((0, 0), (0, Bp - B)))

    def stream_map(i):    # x / output blocks move along the lane (batch) axis
        return (0, i)

    def resident_map(i):  # weights/biases stay pinned in VMEM across all grid steps
        return (0, 0)

    in_specs = [
        pl.BlockSpec((F, tile_b), stream_map),          # xT
        pl.BlockSpec(w0t.shape, resident_map),          # w0'
        pl.BlockSpec(b0t.shape, resident_map),          # b0'
        pl.BlockSpec(w1t.shape, resident_map),          # w1'
        pl.BlockSpec(b1t.shape, resident_map),          # b1'
        pl.BlockSpec(w2t.shape, resident_map),          # w2
        pl.BlockSpec(b2t.shape, resident_map),          # b2
    ]

    flops = 2 * Bp * (7 * 32 + 32 * 16 + 16 * 2)
    param_bytes = 4 * (7 * 32 + 32 + 32 * 16 + 16 + 16 * 2 + 2)
    cost = pl.CostEstimate(
        flops=flops,
        transcendentals=0,
        bytes_accessed=4 * Bp * (7 + 2) + param_bytes,
    )

    out_t = pl.pallas_call(
        mlp_kernel,
        out_shape=jax.ShapeDtypeStruct((2, Bp), jnp.float32),
        grid=grid,
        in_specs=in_specs,
        out_specs=pl.BlockSpec((2, tile_b), stream_map),
        compiler_params=pltpu.CompilerParams(
            dimension_semantics=("parallel",),        # megacore-shards the batch tiles
            vmem_limit_bytes=VMEM_LIMIT_BYTES,
        ),
        cost_estimate=cost,
    )(xt, w0t, b0t, w1t, b1t, w2t, b2t)

    # Back to the module's (B, 2) convention; padded (garbage) columns dropped here.
    return out_t[:, :B].T


def init_params(key):
    ks = jax.random.split(key, 6)

    def linear(kw, kb, fan_in, fan_out):
        bound = 1.0 / jnp.sqrt(fan_in)
        w = jax.random.uniform(kw, (fan_in, fan_out), jnp.float32, -bound, bound)
        b = jax.random.uniform(kb, (1, fan_out), jnp.float32, -bound, bound)
        return w, b

    w0, b0 = linear(ks[0], ks[1], 7, 32)
    w1, b1 = linear(ks[2], ks[3], 32, 16)
    w2, b2 = linear(ks[4], ks[5], 16, 2)

    # BatchNorm1d params (gamma=1, beta=0 default); non-trivial running stats so the
    # BN-folding path is actually exercised.
    k_m0, k_v0, k_m1, k_v1 = jax.random.split(ks[5], 4)
    params = dict(
        w0=w0, b0=b0,
        g0=jnp.ones((1, 32), jnp.float32), be0=jnp.zeros((1, 32), jnp.float32),
        m0=0.1 * jax.random.normal(k_m0, (1, 32), jnp.float32),
        v0=1.0 + 0.1 * jax.random.uniform(k_v0, (1, 32), jnp.float32),
        w1=w1, b1=b1,
        g1=jnp.ones((1, 16), jnp.float32), be1=jnp.zeros((1, 16), jnp.float32),
        m1=0.1 * jax.random.normal(k_m1, (1, 16), jnp.float32),
        v1=1.0 + 0.1 * jax.random.uniform(k_v1, (1, 16), jnp.float32),
        w2=w2, b2=b2,
    )
    return params


def reference_forward(x, p):
    h = x @ p["w0"] + p["b0"]
    h = (h - p["m0"]) * (p["g0"] / jnp.sqrt(p["v0"] + EPS)) + p["be0"]
    h = jnp.maximum(h, 0.0)
    h = h @ p["w1"] + p["b1"]
    h = (h - p["m1"]) * (p["g1"] / jnp.sqrt(p["v1"] + EPS)) + p["be1"]
    h = jnp.maximum(h, 0.0)
    return h @ p["w2"] + p["b2"]


if __name__ == "__main__":
    key = jax.random.PRNGKey(0)
    kx, kp, kx2 = jax.random.split(key, 3)
    params = init_params(kp)

    # Small case: single grid step (tile clamps to the 128-lane minimum).
    B = 32
    x = jax.random.normal(kx, (B, 7), jnp.float32)
    out = jax.block_until_ready(mlp_forward(x, params))
    ref = reference_forward(x, params)
    assert out.shape == (B, 2)
    assert jnp.allclose(out, ref, atol=5e-4, rtol=5e-4), "mismatch vs reference (B=32)"

    # Multi-step grid + ragged batch (tb=128 -> tile_b=128, Bp=384, grid=(3,)).
    B2 = 300
    x2 = jax.random.normal(kx2, (B2, 7), jnp.float32)
    out2 = jax.block_until_ready(mlp_forward(x2, params, tb=128))
    ref2 = reference_forward(x2, params)
    assert out2.shape == (B2, 2)
    assert jnp.allclose(out2, ref2, atol=5e-4, rtol=5e-4), "mismatch vs reference (B=300)"

    print("KERNEL_OK")
</pallas_src>

<mosaic_0001>
module attributes {stable_mosaic.version = 11 : i64} {
  func.func @mlp_kernel(%arg0: i32, %arg1: memref<7x128xf32, #tpu.memory_space<vmem>>, %arg2: memref<32x7xf32, #tpu.memory_space<vmem>>, %arg3: memref<32x1xf32, #tpu.memory_space<vmem>>, %arg4: memref<16x32xf32, #tpu.memory_space<vmem>>, %arg5: memref<16x1xf32, #tpu.memory_space<vmem>>, %arg6: memref<2x16xf32, #tpu.memory_space<vmem>>, %arg7: memref<2x1xf32, #tpu.memory_space<vmem>>, %arg8: memref<2x128xf32, #tpu.memory_space<vmem>>) attributes {dimension_semantics = [#tpu.dimension_semantics<parallel>], iteration_bounds = array<i64: 1>, scalar_prefetch = 0 : i64, scratch_operands = 0 : i64, tpu.core_type = #tpu.core_type<tc>, window_params = [{transform_indices = @transform_0, window_bounds = array<i64: 7, 128>}, {pipeline_mode = #tpu.pipeline_mode<synchronous>, transform_indices = @transform_1, window_bounds = array<i64: 32, 7>}, {pipeline_mode = #tpu.pipeline_mode<synchronous>, transform_indices = @transform_2, window_bounds = array<i64: 32, 1>}, {pipeline_mode = #tpu.pipeline_mode<synchronous>, transform_indices = @transform_3, window_bounds = array<i64: 16, 32>}, {pipeline_mode = #tpu.pipeline_mode<synchronous>, transform_indices = @transform_4, window_bounds = array<i64: 16, 1>}, {pipeline_mode = #tpu.pipeline_mode<synchronous>, transform_indices = @transform_5, window_bounds = array<i64: 2, 16>}, {pipeline_mode = #tpu.pipeline_mode<synchronous>, transform_indices = @transform_6, window_bounds = array<i64: 2, 1>}, {transform_indices = @transform_7, window_bounds = array<i64: 2, 128>}]} {
    %c0 = arith.constant 0 : index
    %c0_0 = arith.constant 0 : index
    %0 = vector.load %arg1[%c0, %c0_0] : memref<7x128xf32, #tpu.memory_space<vmem>>, vector<7x128xf32>
    %c0_1 = arith.constant 0 : index
    %c0_2 = arith.constant 0 : index
    %1 = vector.load %arg2[%c0_1, %c0_2] : memref<32x7xf32, #tpu.memory_space<vmem>>, vector<32x7xf32>
    %cst = arith.constant dense<0.000000e+00> : vector<32x128xf32>
    %2 = tpu.matmul %1, %0, %cst {dimension_numbers = #tpu.dot_dimension_numbers<[1], [0], [0], [1], [0, 0, 1, 1], [], []>} : vector<32x7xf32>, vector<7x128xf32>, vector<32x128xf32> -> vector<32x128xf32>
    %c0_3 = arith.constant 0 : index
    %c0_4 = arith.constant 0 : index
    %3 = vector.load %arg3[%c0_3, %c0_4] : memref<32x1xf32, #tpu.memory_space<vmem>>, vector<32x1xf32>
    %4 = vector.broadcast %3 : vector<32x1xf32> to vector<32x128xf32>
    %5 = arith.addf %2, %4 : vector<32x128xf32>
    %cst_5 = arith.constant 0.000000e+00 : f32
    %6 = vector.broadcast %cst_5 : f32 to vector<32x128xf32>
    %7 = arith.maximumf %5, %6 : vector<32x128xf32>
    %c0_6 = arith.constant 0 : index
    %c0_7 = arith.constant 0 : index
    %8 = vector.load %arg4[%c0_6, %c0_7] : memref<16x32xf32, #tpu.memory_space<vmem>>, vector<16x32xf32>
    %cst_8 = arith.constant dense<0.000000e+00> : vector<16x128xf32>
    %9 = tpu.matmul %8, %7, %cst_8 {dimension_numbers = #tpu.dot_dimension_numbers<[1], [0], [0], [1], [0, 0, 1, 1], [], []>} : vector<16x32xf32>, vector<32x128xf32>, vector<16x128xf32> -> vector<16x128xf32>
    %c0_9 = arith.constant 0 : index
    %c0_10 = arith.constant 0 : index
    %10 = vector.load %arg5[%c0_9, %c0_10] : memref<16x1xf32, #tpu.memory_space<vmem>>, vector<16x1xf32>
    %11 = vector.broadcast %10 : vector<16x1xf32> to vector<16x128xf32>
    %12 = arith.addf %9, %11 : vector<16x128xf32>
    %cst_11 = arith.constant 0.000000e+00 : f32
    %13 = vector.broadcast %cst_11 : f32 to vector<16x128xf32>
    %14 = arith.maximumf %12, %13 : vector<16x128xf32>
    %c0_12 = arith.constant 0 : index
    %c0_13 = arith.constant 0 : index
    %15 = vector.load %arg6[%c0_12, %c0_13] : memref<2x16xf32, #tpu.memory_space<vmem>>, vector<2x16xf32>
    %cst_14 = arith.constant dense<0.000000e+00> : vector<2x128xf32>
    %16 = tpu.matmul %15, %14, %cst_14 {dimension_numbers = #tpu.dot_dimension_numbers<[1], [0], [0], [1], [0, 0, 1, 1], [], []>} : vector<2x16xf32>, vector<16x128xf32>, vector<2x128xf32> -> vector<2x128xf32>
    %c0_15 = arith.constant 0 : index
    %c0_16 = arith.constant 0 : index
    %17 = vector.load %arg7[%c0_15, %c0_16] : memref<2x1xf32, #tpu.memory_space<vmem>>, vector<2x1xf32>
    %18 = vector.broadcast %17 : vector<2x1xf32> to vector<2x128xf32>
    %19 = arith.addf %16, %18 : vector<2x128xf32>
    %c0_17 = arith.constant 0 : index
    %c0_18 = arith.constant 0 : index
    %20 = vector.load %arg8[%c0_17, %c0_18] : memref<2x128xf32, #tpu.memory_space<vmem>>, vector<2x128xf32>
    tpu.vector_store %arg8[%c0_17, %c0_18], %19 {strides = array<i32>} : memref<2x128xf32, #tpu.memory_space<vmem>>, vector<2x128xf32>,
    return
  }
  func.func @transform_0(%arg0: i32) -> (i32, i32) {
    %c0_i32 = arith.constant 0 : i32
    %c0_i32_0 = arith.constant 0 : i32
    return %c0_i32, %arg0 : i32, i32
  }
  func.func @transform_1(%arg0: i32) -> (i32, i32) {
    %c0_i32 = arith.constant 0 : i32
    %c0_i32_0 = arith.constant 0 : i32
    %c0_i32_1 = arith.constant 0 : i32
    return %c0_i32, %c0_i32_0 : i32, i32
  }
  func.func @transform_2(%arg0: i32) -> (i32, i32) {
    %c0_i32 = arith.constant 0 : i32
    %c0_i32_0 = arith.constant 0 : i32
    %c0_i32_1 = arith.constant 0 : i32
    return %c0_i32, %c0_i32_0 : i32, i32
  }
  func.func @transform_3(%arg0: i32) -> (i32, i32) {
    %c0_i32 = arith.constant 0 : i32
    %c0_i32_0 = arith.constant 0 : i32
    %c0_i32_1 = arith.constant 0 : i32
    return %c0_i32, %c0_i32_0 : i32, i32
  }
  func.func @transform_4(%arg0: i32) -> (i32, i32) {
    %c0_i32 = arith.constant 0 : i32
    %c0_i32_0 = arith.constant 0 : i32
    %c0_i32_1 = arith.constant 0 : i32
    return %c0_i32, %c0_i32_0 : i32, i32
  }
  func.func @transform_5(%arg0: i32) -> (i32, i32) {
    %c0_i32 = arith.constant 0 : i32
    %c0_i32_0 = arith.constant 0 : i32
    %c0_i32_1 = arith.constant 0 : i32
    return %c0_i32, %c0_i32_0 : i32, i32
  }
  func.func @transform_6(%arg0: i32) -> (i32, i32) {
    %c0_i32 = arith.constant 0 : i32
    %c0_i32_0 = arith.constant 0 : i32
    %c0_i32_1 = arith.constant 0 : i32
    return %c0_i32, %c0_i32_0 : i32, i32
  }
  func.func @transform_7(%arg0: i32) -> (i32, i32) {
    %c0_i32 = arith.constant 0 : i32
    %c0_i32_0 = arith.constant 0 : i32
    return %c0_i32, %arg0 : i32, i32
  }
}

</mosaic_0001>

<bundles_post_ra>
// kernel: mlp_forward.1
= control target key start
LH: loop header
LB: loop body
LE: loop exit
PB: predicated region body
PF: predicated region fallthrough
CT: control target
= control target key end

     0   :  { %vm68_vm0 = vcmask 1046528   ;;  %vm55_vm1 = vcmask 56320   ;;  %v410_v3 = vmov 0   ;;  %vm175_vm2 = vcmask 261120   ;;  %s508_s0 = inlined_call_operand.vmem [shape: f32[7,128], index: 0, kind: input, shape index: {}]   ;;  %s509_s1 = inlined_call_operand.vmem [shape: f32[32,7], index: 1, kind: input, shape index: {}]   ;;  %s510_s2 = inlined_call_operand.vmem [shape: f32[32,1], index: 2, kind: input, shape index: {}]   ;;  %s511_s4 = inlined_call_operand.vmem [shape: f32[16,1], index: 4, kind: input, shape index: {}]   ;;  %s512_s6 = inlined_call_operand.vmem [shape: f32[2,1], index: 6, kind: input, shape index: {}]   ;;  %s513_s3 = inlined_call_operand.vmem [shape: f32[16,32], index: 3, kind: input, shape index: {}]   ;;  %s514_s5 = inlined_call_operand.vmem [shape: f32[2,16], index: 5, kind: input, shape index: {}]   ;;  %s515_s7 = inlined_call_operand.vmem [shape: f32[2,128], index: 7, kind: output, shape index: {}]  }
   0x1   :  { %v26_v0 = vld [vmem:[%s508_s0] sm:$0x7f]  ;;  %v28_v2 = vld [vmem:[%s509_s1 + $0x8] sm:$0xff]  ;;  %408 = vset.pattern.permute.xlu0 %v410_v3  ;;  %409 = vset.pattern.permute.xlu1 %v410_v3  ;;  %v29_v4 = vld [vmem:[%s509_s1 + $0x10] sm:$0xff]  ;;  %v411_v33 = vmov 0.0|0.0   ;;  %vm412_vm3 = vmmov 0  }
   0x2   :  { %v27_v1 = vld [vmem:[%s509_s1] sm:$0xff]  ;;  %367 = vmatprep.subr.msk.mxu0 %vm68_vm0, %v26_v0  ;;  %v33_v6 = vld [vmem:[%s510_s2 + $0x10] sm:$0xff]  ;;  %v32_v7 = vld [vmem:[%s510_s2 + $0x8] sm:$0xff]  ;;  %v413_v34 = vmov 0.0   ;;  %vm266_vm4 = vcmask 130048  }
   0x3   :  { %369 = vmatprep.mubr.msk.f32.mxu0 %vm55_vm1, %v27_v1  ;;  %v31_v5 = vld [vmem:[%s510_s2] sm:$0xff]  ;;  %368 = vmatpush3.msk.msra.mxu0 %vm68_vm0, %v26_v0  ;;  %v30_v8 = vld [vmem:[%s509_s1 + $0x18] sm:$0xff]  ;;  %v164_v11 = vld [vmem:[%s511_s4 + $0x8] sm:$0xff] }
   0x4   :  { %37 = vperm.xlu0 %408, %v31_v5   ;;  %370 = vmatmul.mubr.msk.f32.vlgmr.msra.gmra.mrb[0].mxu0 %vm55_vm1, %v28_v2  ;;  %v34_v9 = vld [vmem:[%s510_s2 + $0x18] sm:$0xff]  ;;  %v163_v10 = vld [vmem:[%s511_s4] sm:$0xff]  ;;  %v162_v32 = vld [vmem:[%s513_s3 + $0x8] sm:$0xff] }
   0x5   :  { %47 = vperm.xlu1 %409, %v33_v6   ;;  %372 = vmatprep.mubr.msk.f32.mxu0 %vm55_vm1, %v29_v4  ;;  %v260_v12 = vld [vmem:[%s512_s6] sm:$0x3] }
   0x6   :  { %v161_v13 = vld [vmem:[%s513_s3] sm:$0xff]  ;;  %401 = vmatprep.subr.bf16.mxu0 %v411_v33 }
   0x7   :  { %383 = vmatprep.mubr.msk.f32.mxu1 %vm175_vm2, %v161_v13  ;;  %v259_v44 = vld [vmem:[%s514_s5] sm:$0x3] }
   0x8   :  { %42 = vperm.xlu0 %408, %v32_v7   ;;  %373 = vmatmul.mubr.msk.f32.gmra.mrb[2].mxu0 %vm55_vm1, %v30_v8 }
   0x9   :  { %52 = vperm.xlu1 %409, %v34_v9   ;;  %390 = vmatprep.mubr.msk.f32.mxu0 %vm412_vm3, %v413_v34 }
   0xc   :  { %167 = vperm.xlu0 %408, %v163_v10  }
   0xd   :  { %172 = vperm.xlu1 %409, %v164_v11  }
  0x10   :  { %263 = vperm.xlu0 %408, %v260_v12  }
  0x83   :  { %v38_v14 = vpop.permute.xlu0 %37 }
  0x84   :  { %v48_v15 = vpop.permute.xlu1 %47 }
  0x87   :  { %v43_v16 = vpop.permute.xlu0 %42 }
  0x88   :  { %v53_v22 = vpop.permute.xlu1 %52 }
  0x8b   :  { %v168_v37 = vpop.permute.xlu0 %167 }
  0x8c   :  { %v173_v35 = vpop.permute.xlu1 %172 }
  0x8f   :  { %v264_v45 = vpop.permute.xlu0 %263 }
  0xd7   :  { %v371_v17 = vpop.f32.mrb[0].mxu0 }
  0xd8   :  { %v144_v18 = vadd.f32 %v371_v17, %v43_v16  ;;  %v138_v19 = vpop.f32.mrb[1].mxu0 }
  0xd9   :  { %v139_v20 = vadd.f32 %v138_v19, %v38_v14 }
  0xda   :  { %v158_v21 = vmax.f32 %v144_v18, 0.0 }
  0xdb   :  { %v157_v23 = vmax.f32 %v139_v20, 0.0  ;;  %v374_v24 = vpop.f32.mrb[2].mxu0 }
  0xdc   :  { %v154_v25 = vadd.f32 %v374_v24, %v53_v22  ;;  %v148_v26 = vpop.f32.mrb[3].mxu0 }
  0xdd   :  { %v149_v27 = vadd.f32 %v148_v26, %v48_v15  ;;  %v393_v28 = vpack.c.bf16 %v158_v21, %v157_v23 }
  0xde   :  { %v160_v29 = vmax.f32 %v154_v25, 0.0 }
  0xdf   :  { %v159_v30 = vmax.f32 %v149_v27, 0.0  ;;  %394 = vmatprep.subr.bf16.mxu1 %v393_v28 }
  0xe0   :  { %396 = vmatpush3.bf16.msra.mxu1 %v393_v28 }
  0xe1   :  { %v397_v31 = vpack.c.bf16 %v160_v29, %v159_v30 }
  0xe3   :  { %398 = vmatprep.subr.bf16.mxu1 %v397_v31 }
  0xe4   :  { %400 = vmatpush3.bf16.msra.mxu1 %v397_v31 }
  0xe7   :  { %384 = vmatmul.mubr.msk.f32.vlgmr.msra.gmra.mrb[0].mxu1 %vm175_vm2, %v162_v32 }
 0x1ba   :  { %v385_v36 = vpop.f32.mrb[0].mxu1 }
 0x1bb   :  { %v254_v38 = vadd.f32 %v385_v36, %v173_v35  ;;  %v248_v39 = vpop.f32.mrb[1].mxu1 }
 0x1bc   :  { %v249_v40 = vadd.f32 %v248_v39, %v168_v37 }
 0x1bd   :  { %v258_v41 = vmax.f32 %v254_v38, 0.0 }
 0x1be   :  { %v257_v42 = vmax.f32 %v249_v40, 0.0 }
 0x1c0   :  { %v402_v43 = vpack.c.bf16 %v258_v41, %v257_v42 }
 0x1c2   :  { %403 = vmatpush3.bf16.msra.mxu0 %v402_v43 }
 0x1c5   :  { %391 = vmatmul.mubr.msk.f32.vlgmr.msra.gmra.mrb[4].mxu0 %vm266_vm4, %v259_v44 }
 0x298   :  { %v336_v46 = vpop.f32.mrb[4].mxu0 }
 0x299   :  { %v337_v47 = vadd.f32 %v336_v46, %v264_v45  ;;  %v392_v48 = vpop.f32.mrb[5].mxu0 }
 0x29b   :  { %340 = vst [vmem:[%s515_s7] sm:$0x3] %v337_v47 }

</bundles_post_ra>
